<compile_context>
chip_gen: v7x
topology: tpu7x:2x2x1
jax: 0.10.0
libtpu: 0.0.40
codegen_flags: <defaults>
</compile_context>

<pallas_src>
import functools

import jax
import jax.numpy as jnp
from jax.experimental import pallas as pl
from jax.experimental.pallas import tpu as pltpu


# ----------------------------------------------------------------------------
# Fused kernel: 1x1 conv (channel-weighted sum) + bias + sigmoid + gating
# ----------------------------------------------------------------------------
def _spatial_se_kernel(x_ref, w_ref, b_ref, o_ref):
    # x_ref: (Nb, C, T)   w_ref: (1, C, 1)  (input dtype)   b_ref: (1, 1, 1) f32
    x = x_ref[...]                                            # stays in input dtype
    # 1x1 conv over channels == per-pixel weighted channel sum: VPU multiply +
    # cross-sublane XLU reduce, accumulated in f32.  C is tiny -> no MXU.
    z = jnp.sum(x * w_ref[...], axis=1, keepdims=True,
                dtype=jnp.float32) + b_ref[...]               # (Nb, 1, T) f32
    s = 1.0 / (1.0 + jnp.exp(-z))                             # sigmoid (EUP exp; divide
                                                              #  is on the tiny (Nb,1,T))
    o_ref[...] = (x * s.astype(x.dtype)).astype(o_ref.dtype)  # gate in input dtype


# ----------------------------------------------------------------------------
# Block-size selection (all static Python ints at trace time)
# ----------------------------------------------------------------------------
def _choose_block(N, C, HW, itemsize, block_bytes):
    """Pick (Nb, t) for block_shape (Nb, C, t), budgeting *padded* VMEM bytes."""
    sub = max(8, 32 // itemsize)                 # sublane tile: 8 f32 / 16 bf16 / 32 i8
    c_pad = -(-C // sub) * sub                   # sublane-padded channel count
    hw_pad = -(-HW // 128) * 128                 # lane-padded spatial extent
    per_image = c_pad * hw_pad * itemsize        # VMEM bytes for one image's block

    if per_image <= block_bytes:
        # Whole spatial extent per step (block last dim == full array dim, so no
        # 128-divisibility requirement and no padding); block batch images too.
        t = HW
        want_nb = max(1, block_bytes // per_image)
        # Keep >= 2 grid steps when N >= 2 so v7x can split across its 2 TCs.
        cap = max(1, min(want_nb, N // 2)) if N >= 2 else 1
        nb = max(d for d in range(1, cap + 1) if N % d == 0)   # divisor of N
    else:
        # Tile the spatial axis in 128-lane-aligned chunks; the ragged last tile
        # (HW % t != 0) is handled by Pallas' block-boundary masking, so no
        # host-side pad/slice is needed.
        nb = 1
        t = max(1, block_bytes // (c_pad * itemsize)) // 128 * 128
        t = max(128, min(t, (HW // 128) * 128))
        if HW < 128:
            # Tiny spatial with very large C: fall back to full spatial dim.
            # (C itself is kept untiled; SE layers have modest channel counts.)
            t = HW
    return nb, t


# ----------------------------------------------------------------------------
# Jitted implementation
# ----------------------------------------------------------------------------
@functools.partial(jax.jit, static_argnames=("block_bytes",))
def _spatial_se_impl(x_nchw, w_c, b_1, *, block_bytes=3 * 1024 * 1024):
    N, C, H, W = x_nchw.shape
    HW = H * W
    dtype = x_nchw.dtype
    itemsize = dtype.itemsize

    # Flatten spatial dims onto the lane axis (pure view reshape of NCHW).
    x_flat = x_nchw.reshape(N, C, HW)
    w = w_c.reshape(1, C, 1).astype(dtype)          # gate weights in input dtype
    b = b_1.reshape(1, 1, 1).astype(jnp.float32)    # bias accumulated in f32

    nb, t = _choose_block(N, C, HW, itemsize, block_bytes)
    grid = (N // nb, pl.cdiv(HW, t))

    cost = pl.CostEstimate(
        flops=3 * N * C * HW,                       # channel mul+add + gate mul
        transcendentals=N * HW,                     # one exp per pixel
        bytes_accessed=2 * N * C * HW * itemsize)   # one read + one write of x

    out_flat = pl.pallas_call(
        _spatial_se_kernel,
        out_shape=jax.ShapeDtypeStruct((N, C, HW), dtype),
        grid_spec=pltpu.PrefetchScalarGridSpec(
            num_scalar_prefetch=0,
            grid=grid,
            in_specs=[
                pl.BlockSpec((nb, C, t), lambda n, j: (n, 0, j)),
                pl.BlockSpec((1, C, 1), lambda n, j: (0, 0, 0)),
                pl.BlockSpec((1, 1, 1), lambda n, j: (0, 0, 0)),
            ],
            out_specs=pl.BlockSpec((nb, C, t), lambda n, j: (n, 0, j)),
        ),
        compiler_params=pltpu.CompilerParams(
            dimension_semantics=("parallel", "parallel")),
        cost_estimate=cost,
    )(x_flat, w, b)

    return out_flat.reshape(N, C, H, W)


# ----------------------------------------------------------------------------
# Public wrapper (mirrors SpatialSELayer.forward, incl. optional `weights`)
# ----------------------------------------------------------------------------
def spatial_se_forward(input_tensor, conv_weight, conv_bias, weights=None,
                       *, block_bytes=3 * 1024 * 1024):
    """SpatialSELayer forward.

    input_tensor: (N, C, H, W)
    conv_weight:  (1, C, 1, 1)  -- nn.Conv2d(C, 1, 1).weight
    conv_bias:    (1,)          -- nn.Conv2d(C, 1, 1).bias
    weights:      optional few-shot weights; mean over axis 0 is used as the
                  1x1 conv weight with no bias (PyTorch F.conv2d branch).
    """
    C = input_tensor.shape[1]
    if weights is not None:
        w = jnp.mean(weights, axis=0).reshape(C)     # tiny glue, stays in JAX
        b = jnp.zeros((1,), input_tensor.dtype)
    else:
        w = conv_weight.reshape(C)
        b = conv_bias.reshape(1)
    return _spatial_se_impl(input_tensor, w, b, block_bytes=block_bytes)


# ----------------------------------------------------------------------------
# Pure-JAX reference (for correctness check)
# ----------------------------------------------------------------------------
def spatial_se_reference(x, conv_weight, conv_bias):
    w = conv_weight.reshape(1, -1, 1, 1)
    z = jnp.sum(x * w, axis=1, keepdims=True) + conv_bias.reshape(1, 1, 1, 1)
    s = jax.nn.sigmoid(z)
    return x * s


if __name__ == "__main__":
    key = jax.random.PRNGKey(0)
    k_x, k_w, k_b = jax.random.split(key, 3)

    N, C, H, W = 2, 4, 16, 16
    x = jax.random.normal(k_x, (N, C, H, W), dtype=jnp.float32)

    # nn.Conv2d(C, 1, 1) default init: U(-1/sqrt(fan_in), 1/sqrt(fan_in)).
    fan_in = C
    bound = 1.0 / (fan_in ** 0.5)
    weight = jax.random.uniform(k_w, (1, C, 1, 1), minval=-bound, maxval=bound,
                                dtype=jnp.float32)
    bias = jax.random.uniform(k_b, (1,), minval=-bound, maxval=bound,
                              dtype=jnp.float32)

    # Standard path.
    out = jax.block_until_ready(spatial_se_forward(x, weight, bias))
    ref = spatial_se_reference(x, weight, bias)
    assert out.shape == (N, C, H, W)
    assert jnp.allclose(out, ref, atol=1e-5, rtol=1e-5), "mismatch vs reference"

    # Few-shot branch: `weights` provided, averaged over dim 0, no bias.
    few_shot_w = jax.random.normal(jax.random.PRNGKey(1), (3, C), dtype=jnp.float32)
    out_fs = jax.block_until_ready(
        spatial_se_forward(x, weight, bias, weights=few_shot_w))
    ref_fs = spatial_se_reference(
        x, jnp.mean(few_shot_w, axis=0), jnp.zeros((1,), jnp.float32))
    assert jnp.allclose(out_fs, ref_fs, atol=1e-5, rtol=1e-5), "few-shot mismatch"

    print("KERNEL_OK")
</pallas_src>

<mosaic_0001>
module attributes {stable_mosaic.version = 11 : i64} {
  func.func @_spatial_se_kernel(%arg0: i32, %arg1: i32, %arg2: memref<1x4x256xf32, #tpu.memory_space<vmem>>, %arg3: memref<1x4x1xf32, #tpu.memory_space<vmem>>, %arg4: memref<1x1x1xf32, #tpu.memory_space<vmem>>, %arg5: memref<1x4x256xf32, #tpu.memory_space<vmem>>) attributes {dimension_semantics = [#tpu.dimension_semantics<parallel>, #tpu.dimension_semantics<parallel>], iteration_bounds = array<i64: 2, 1>, scalar_prefetch = 0 : i64, scratch_operands = 0 : i64, tpu.core_type = #tpu.core_type<tc>, window_params = [{transform_indices = @transform_0, window_bounds = array<i64: 1, 4, 256>}, {pipeline_mode = #tpu.pipeline_mode<synchronous>, transform_indices = @transform_1, window_bounds = array<i64: 1, 4, 1>}, {pipeline_mode = #tpu.pipeline_mode<synchronous>, transform_indices = @transform_2, window_bounds = array<i64: 1, 1, 1>}, {transform_indices = @transform_3, window_bounds = array<i64: 1, 4, 256>}]} {
    %c0 = arith.constant 0 : index
    %c0_0 = arith.constant 0 : index
    %c0_1 = arith.constant 0 : index
    %0 = vector.load %arg2[%c0, %c0_0, %c0_1] : memref<1x4x256xf32, #tpu.memory_space<vmem>>, vector<1x4x256xf32>
    %c0_2 = arith.constant 0 : index
    %c0_3 = arith.constant 0 : index
    %c0_4 = arith.constant 0 : index
    %1 = vector.load %arg3[%c0_2, %c0_3, %c0_4] : memref<1x4x1xf32, #tpu.memory_space<vmem>>, vector<1x4x1xf32>
    %2 = vector.broadcast %1 : vector<1x4x1xf32> to vector<1x4x256xf32>
    %3 = arith.mulf %0, %2 : vector<1x4x256xf32>
    %cst = arith.constant dense<0.000000e+00> : vector<1x256xf32>
    %4 = vector.multi_reduction <add>, %3, %cst [1] : vector<1x4x256xf32> to vector<1x256xf32>
    %5 = vector.shape_cast %4 : vector<1x256xf32> to vector<1x1x256xf32>
    %c0_5 = arith.constant 0 : index
    %c0_6 = arith.constant 0 : index
    %c0_7 = arith.constant 0 : index
    %6 = vector.load %arg4[%c0_5, %c0_6, %c0_7] : memref<1x1x1xf32, #tpu.memory_space<vmem>>, vector<1x1x1xf32>
    %7 = vector.broadcast %6 : vector<1x1x1xf32> to vector<1x1x256xf32>
    %8 = arith.addf %5, %7 : vector<1x1x256xf32>
    %cst_8 = arith.constant 0.000000e+00 : f32
    %9 = vector.broadcast %cst_8 : f32 to vector<1x1x256xf32>
    %10 = arith.subf %9, %8 : vector<1x1x256xf32>
    %11 = math.exp %10 : vector<1x1x256xf32>
    %cst_9 = arith.constant 1.000000e+00 : f32
    %12 = vector.broadcast %cst_9 : f32 to vector<1x1x256xf32>
    %13 = arith.addf %12, %11 : vector<1x1x256xf32>
    %cst_10 = arith.constant 1.000000e+00 : f32
    %14 = vector.broadcast %cst_10 : f32 to vector<1x1x256xf32>
    %15 = arith.divf %14, %13 : vector<1x1x256xf32>
    %16 = vector.broadcast %15 : vector<1x1x256xf32> to vector<1x4x256xf32>
    %17 = arith.mulf %0, %16 : vector<1x4x256xf32>
    %c0_11 = arith.constant 0 : index
    %c0_12 = arith.constant 0 : index
    %c0_13 = arith.constant 0 : index
    %18 = vector.load %arg5[%c0_11, %c0_12, %c0_13] : memref<1x4x256xf32, #tpu.memory_space<vmem>>, vector<1x4x256xf32>
    tpu.vector_store %arg5[%c0_11, %c0_12, %c0_13], %17 {strides = array<i32>} : memref<1x4x256xf32, #tpu.memory_space<vmem>>, vector<1x4x256xf32>,
    return
  }
  func.func @transform_0(%arg0: i32, %arg1: i32) -> (i32, i32, i32) {
    %c0_i32 = arith.constant 0 : i32
    %c0_i32_0 = arith.constant 0 : i32
    return %arg0, %c0_i32, %arg1 : i32, i32, i32
  }
  func.func @transform_1(%arg0: i32, %arg1: i32) -> (i32, i32, i32) {
    %c0_i32 = arith.constant 0 : i32
    %c0_i32_0 = arith.constant 0 : i32
    %c0_i32_1 = arith.constant 0 : i32
    %c0_i32_2 = arith.constant 0 : i32
    return %c0_i32, %c0_i32_0, %c0_i32_1 : i32, i32, i32
  }
  func.func @transform_2(%arg0: i32, %arg1: i32) -> (i32, i32, i32) {
    %c0_i32 = arith.constant 0 : i32
    %c0_i32_0 = arith.constant 0 : i32
    %c0_i32_1 = arith.constant 0 : i32
    %c0_i32_2 = arith.constant 0 : i32
    return %c0_i32, %c0_i32_0, %c0_i32_1 : i32, i32, i32
  }
  func.func @transform_3(%arg0: i32, %arg1: i32) -> (i32, i32, i32) {
    %c0_i32 = arith.constant 0 : i32
    %c0_i32_0 = arith.constant 0 : i32
    return %arg0, %c0_i32, %arg1 : i32, i32, i32
  }
}

</mosaic_0001>

<bundles_post_ra>
// kernel: _spatial_se_impl.1
= control target key start
LH: loop header
LB: loop body
LE: loop exit
PB: predicated region body
PF: predicated region fallthrough
CT: control target
= control target key end

     0   :  { %s459_s14 = smov 0   ;;  %s461_s15 = smov 0   ;;  %s502_s0 = inlined_call_operand.vmem [shape: f32[2,4,256], index: 0, kind: input, shape index: {}]   ;;  %s503_s1 = inlined_call_operand.vmem [shape: f32[1,4,1], index: 1, kind: input, shape index: {}]   ;;  %s504_s2 = inlined_call_operand.<no memory space> [shape: f32[1,1,1], index: 2, kind: input, shape index: {}]   ;;  %s505_s3 = inlined_call_operand.vmem [shape: f32[2,4,256], index: 3, kind: output, shape index: {}]  }
   0x1   :  { %v8_v0 = vstv %s504_s2  ;;  %s463_s16 = smov 0  }
   0x2   :  { %9 = vst [vmem:[#allocation2] sm:$0x1] %v8_v0 }
   0x3 LB: > { %s27_s2 = sadd.s32 1, %s428_s15  ;;  %p366_p0 = scmp.ge.s32.totalorder %s432_s16, 1  ;;  %s432_s16 = sphi %s463_s16, %s15_s16   ;;  %s428_s15 = sphi %s461_s15, %s507_s15   ;;  %s424_s14 = sphi %s459_s14, %s506_s14  }
   0x4   : > { %p29_p1 = scmp.ge.s32.totalorder %s27_s2, 2  ;;  %p160_p2 = scmp.lt.s32.totalorder %s432_s16, 3 }
   0x6   : > { %s509_s2 = smov (%p29_p1, %s27_s2), 0  ;;  %p161_p3 = pnand %p366_p0, %p160_p2 }
   0x7   : > { %v213_v1 = vld [vmem:[%s503_s1] sm:$0xf] (!%p161_p3)  ;;  %v434_v2 = vmov (!%p161_p3), 0   ;;  %p193_p4 = scmp.lt.s32.totalorder (!%p161_p3), %s424_s14, 1  ;;  %v435_v4 = vmov (!%p161_p3), 839922192   ;;  %v221_v6 = vlaneseq (!%p161_p3) }
   0x8   : > { %164 = sbr.rel (%p161_p3) target bundleno = 191 (0xbf), region = 32  ;;  %401 = vset.pattern.permute.xlu0 (!%p161_p3), %v434_v2  ;;  %v219_v5 = vunpack.c.l.s4 (!%p161_p3), %v435_v4  ;;  %vm230_vm0 = vcmask (!%p161_p3), 1043456  }
   0x9   : > { %216 = vperm.xlu0 (!%p161_p3), %401, %v213_v1   ;;  %v245_v3 = vld [vmem:[#allocation2] sm:$0x1] (!%p161_p3)  ;;  %v222_v8 = vshrl.u32 (!%p161_p3), %v221_v6, 7 }
   0xa   : > { %v220_v7 = vunpack.c.0.s8 (!%p161_p3), %v219_v5 }
   0xb   : > { %v253_v22 = vsub.s32 (!%p161_p3), 0, %v222_v8 }
   0xc   : > { %v223_v9 = vsub.s32 (!%p161_p3), %v220_v7, %v222_v8 }
   0xd   : > { %248 = vperm.xlu0 (!%p161_p3), %401, %v245_v3  }
   0xf   : > { %s511_s14 = smov (!%p193_p4, %s424_s14), 1 }
  0x10   : > { %s373_s19 = sshll.u32 %s511_s14, 3 }
  0x11   : > { %s200_s22 = scalar_lea.vmem %s502_s0, %s373_s19  ;;  %s210_s25 = scalar_lea.vmem %s505_s3, %s373_s19 }
  0x12   : > { %v212_v11 = vld [vmem:[%s200_s22] sm:$0xff] }
  0x88   : > { %v217_v10 = vpop.permute.xlu0 %216 }
  0x89   : > { %v224_v12 = vrot.slane %v217_v10, %v223_v9 }
  0x8b   : > { %v226_v13 = vmul.f32 %v224_v12, %v212_v11 }
  0x8c   : > { %v249_v25 = vpop.permute.xlu0 %248 }
  0x8d   : > { %v228_v14 = vcombine.high %v226_v13, %v226_v13  ;;  %v231_v15 = vsel %vm230_vm0, %v226_v13, 0.0  ;;  %v254_v30 = vrot.slane %v249_v25, %v253_v22 }
  0x8e   : > { %v232_v16 = vrot.slane %v231_v15, 4 }
  0x8f   : > { %v238_v17 = vsel %vm230_vm0, %v228_v14, 0.0 }
  0x90   : > { %v233_v18 = vadd.f32 %v232_v16, %v231_v15  ;;  %v239_v19 = vrot.slane %v238_v17, 4 }
  0x92   : > { %v234_v20 = vrot.slane %v233_v18, 2  ;;  %v240_v21 = vadd.f32 %v239_v19, %v238_v17 }
  0x94   : > { %v235_v23 = vadd.f32 %v234_v20, %v233_v18  ;;  %v241_v24 = vrot.slane %v240_v21, 2 }
  0x96   : > { %v236_v26 = vrot.slane %v235_v23, 1  ;;  %v242_v27 = vadd.f32 %v241_v24, %v240_v21 }
  0x98   : > { %v237_v28 = vadd.f32 %v236_v26, %v235_v23  ;;  %v243_v29 = vrot.slane %v242_v27, 1 }
  0x9a   : > { %v244_v31 = vadd.f32 %v243_v29, %v242_v27  ;;  %v255_v32 = vadd.f32 %v254_v30, %v237_v28 }
  0x9c   : > { %v256_v33 = vadd.f32 %v254_v30, %v244_v31  ;;  %v257_v34 = vsub.f32 0.0, %v255_v32 }
  0x9e   : > { %v258_v35 = vsub.f32 0.0, %v256_v33  ;;  %v259_v36 = vmul.f32 1.442695, %v257_v34 }
  0xa0   : > { %402 = vpow2.f32 %v259_v36  ;;  %v261_v37 = vmul.f32 1.442695, %v258_v35 }
  0xa2   : > { %404 = vpow2.f32 %v261_v37 }
  0xaa   : > { %v403_v38 = vpop.eup %402 }
  0xab   : > { %v263_v39 = vadd.f32 1.0, %v403_v38 }
  0xac   : > { %v405_v40 = vpop.eup %404 }
  0xad   : > { %v264_v41 = vadd.f32 1.0, %v405_v40  ;;  %406 = vrcp.f32 %v263_v39 }
  0xaf   : > { %408 = vrcp.f32 %v264_v41 }
  0xb7   : > { %v407_v42 = vpop.eup %406 }
  0xb9   : > { %v409_v43 = vpop.eup %408 }
  0xba   : > { %v271_v44 = vcombine.low %v407_v42, %v409_v43 }
  0xbc   : > { %v273_v45 = vmul.f32 %v271_v44, %v212_v11 }
  0xbe   : > { %274 = vst [vmem:[%s210_s25] sm:$0xff] %v273_v45 }
  0xbf PF: > { %s15_s16 = sadd.s32 1, %s432_s16   ;;  %s506_s14 = smov %s428_s15 }
  0xc0   : > { %p12_p5 = scmp.ge.s32.totalorder %s15_s16, 4   ;;  %s507_s15 = smov %s509_s2 }
  0xc2   :  { %14 = sbr.rel (!%p12_p5) target bundleno = 3 (0x3), region = 62 }

</bundles_post_ra>
